<compile_context>
chip_gen: v5e
topology: v5e:2x2
jax: 0.10.0
libtpu: 0.0.40
codegen_flags: <defaults>
</compile_context>

<pallas_src>
from functools import partial

import jax
import jax.numpy as jnp
from jax.experimental import pallas as pl
from jax.experimental.pallas import tpu as pltpu


def _triplet_att_kernel(utt_pos_ref, utt_neg_ref, per_t_hbm, inv_p_ref,
                        out_ref,
                        per_t_vmem, acc_e_pos, acc_es_pos, acc_e_neg, acc_es_neg,
                        *, alpha, gamma, inv_eps, n_pos, total_rows):
    i = pl.program_id(0)
    last = pl.num_programs(0) - 1
    tile_m = utt_pos_ref.shape[0]

    @pl.when(i == 0)
    def _init():
        # Single-residency persona operand: one DMA of the pre-transposed,
        # lane-dense (D, Np+Nn) matrix into VMEM.
        pltpu.sync_copy(per_t_hbm, per_t_vmem)
        acc_e_pos[...] = jnp.zeros_like(acc_e_pos)
        acc_es_pos[...] = jnp.zeros_like(acc_es_pos)
        acc_e_neg[...] = jnp.zeros_like(acc_e_neg)
        acc_es_neg[...] = jnp.zeros_like(acc_es_neg)

    upos = utt_pos_ref[...]
    uneg = utt_neg_ref[...]

    def inv_norm(x):                                   # (tile_m, 1) f32
        xf = x.astype(jnp.float32)
        return jax.lax.rsqrt(jnp.sum(xf * xf, axis=1, keepdims=True))

    inv_up = inv_norm(upos)
    inv_un = inv_norm(uneg)

    per_t = per_t_vmem[...]                            # (D, Np+Nn), native dtype
    inv_p = inv_p_ref[...]                             # (1, Np+Nn) f32

    # Raw MXU matmuls in the inputs' native dtype; f32 accumulation.
    raw_pos = jnp.dot(upos, per_t, preferred_element_type=jnp.float32)
    raw_neg = jnp.dot(uneg, per_t, preferred_element_type=jnp.float32)

    # cos = raw / max(||u||*||p||, eps) == raw * min(inv||u||*inv||p||, 1/eps)
    s_pos = raw_pos * jnp.minimum(inv_up * inv_p, inv_eps)
    s_neg = raw_neg * jnp.minimum(inv_un * inv_p, inv_eps)

    def exp_of(s):                                     # att_soft skips the mul
        return jnp.exp(s) if gamma == 1.0 else jnp.exp(gamma * s)

    def accum(e_p, es_p, e_n, es_n):
        # Axis-0-only partial reductions into lane-vector accumulators; the
        # cross-lane reduction happens once in _finalize.
        acc_e_pos[...] += jnp.sum(e_p, axis=0, keepdims=True)
        acc_es_pos[...] += jnp.sum(es_p, axis=0, keepdims=True)
        acc_e_neg[...] += jnp.sum(e_n, axis=0, keepdims=True)
        acc_es_neg[...] += jnp.sum(es_n, axis=0, keepdims=True)

    ragged = (total_rows % tile_m) != 0                # trace-time constant
    if ragged:
        @pl.when(i < last)
        def _full_tiles():
            e_p = exp_of(s_pos)
            e_n = exp_of(s_neg)
            accum(e_p, e_p * s_pos, e_n, e_n * s_neg)

        @pl.when(i == last)
        def _last_tile():
            rem = total_rows % tile_m
            valid = jax.lax.broadcasted_iota(jnp.int32, (tile_m, 1), 0) < rem
            # Mask s before exp so garbage OOB rows never produce inf/NaN.
            sp = jnp.where(valid, s_pos, 0.0)
            sn = jnp.where(valid, s_neg, 0.0)
            e_p = jnp.where(valid, exp_of(sp), 0.0)
            e_n = jnp.where(valid, exp_of(sn), 0.0)
            accum(e_p, e_p * sp, e_n, e_n * sn)
    else:
        e_p = exp_of(s_pos)
        e_n = exp_of(s_neg)
        accum(e_p, e_p * s_pos, e_n, e_n * s_neg)

    @pl.when(i == last)
    def _finalize():
        ncat = acc_e_pos.shape[1]
        is_pos = jax.lax.broadcasted_iota(jnp.int32, (1, ncat), 1) < n_pos
        ae_p, aes_p = acc_e_pos[...], acc_es_pos[...]
        ae_n, aes_n = acc_e_neg[...], acc_es_neg[...]
        zero = jnp.zeros((), jnp.float32)
        # Split the stacked lanes once (p2p / p2n from the pos-LHS stats,
        # n2p from the neg-LHS stats; the n2n lanes are simply never read).
        e_pp = jnp.sum(jnp.where(is_pos, ae_p, zero))
        es_pp = jnp.sum(jnp.where(is_pos, aes_p, zero))
        e_pn = jnp.sum(jnp.where(is_pos, zero, ae_p))
        es_pn = jnp.sum(jnp.where(is_pos, zero, aes_p))
        e_np = jnp.sum(jnp.where(is_pos, ae_n, zero))
        es_np = jnp.sum(jnp.where(is_pos, aes_n, zero))
        # One-shot scalars: exact division, no approx reciprocal.
        p2p_l = es_pp / e_pp
        n2p_l = es_np / e_np
        p2n_l = es_pn / e_pn
        loss = (jnp.maximum(0.0, alpha - p2p_l + n2p_l)
                + jnp.maximum(0.0, alpha - p2p_l + p2n_l))
        out_ref[0, 0] = loss


def triplet_att_loss(utt_pos, per_pos, utt_neg, per_neg, *,
                     att_type="att_soft", alpha=0.2, gamma=1.0, eps=1e-6,
                     row_tile=512, vmem_limit_bytes=None):
    if att_type == "att_sparse":
        # TODO(synk): Sparsemax (sort-based simplex projection) not implemented.
        raise NotImplementedError("att_sparse not implemented")
    if att_type not in ("att_soft", "att_sharp"):
        raise ValueError(f"unknown att_type: {att_type}")
    # att_soft is att_sharp with gamma == 1.0 (handled at trace time).
    g = 1.0 if att_type == "att_soft" else float(gamma)

    M, D = utt_pos.shape
    if utt_neg.shape != (M, D):
        raise ValueError("utt_pos and utt_neg must have identical shapes")
    Np, Dp = per_pos.shape
    Nn, Dn = per_neg.shape
    if Dp != D or Dn != D:
        raise ValueError("all inputs must share the feature dim")
    ncat = Np + Nn

    # Dtype-aware sublane pack: 8 (4-byte) / 16 (2-byte) / 32 (1-byte).
    utt_itemsize = jnp.dtype(utt_pos.dtype).itemsize
    pack = max(8, 32 // utt_itemsize)
    if row_tile % pack != 0:
        raise ValueError(
            f"row_tile must be a multiple of {pack} for dtype {utt_pos.dtype}")

    # One-time layout plumbing (not compute hoisting): stacked, pre-transposed
    # lane-dense persona operand (D, Np+Nn) + its (1, Np+Nn) inverse norms.
    per_cat = jnp.concatenate([per_pos, per_neg], axis=0)      # (ncat, D)
    per_cat_t = per_cat.T                                       # (D, ncat)
    per_f32 = per_cat.astype(jnp.float32)
    inv_p = jax.lax.rsqrt(jnp.sum(per_f32 * per_f32, axis=1)).reshape(1, ncat)

    per_itemsize = jnp.dtype(per_cat_t.dtype).itemsize

    def _rup(x, m):
        return ((x + m - 1) // m) * m

    lane_cat = _rup(ncat, 128)
    lane_d = _rup(D, 128)

    def _vmem_estimate(tm):
        persona = _rup(D, 8) * lane_cat * per_itemsize          # single VMEM copy
        accs = 5 * 8 * lane_cat * 4                             # accumulators + inv_p
        utt = 2 * 2 * tm * lane_d * utt_itemsize                # 2 inputs, 2 buffers
        temps = 10 * tm * lane_cat * 4 + 2 * tm * lane_d * 4    # raw/s/e/es + f32 casts
        return persona + accs + utt + temps

    # Budget row tiles against v7x's 64 MiB VMEM (also safe for v5e/v6e).
    tile_m = M if M <= row_tile else row_tile
    budget = 40 << 20
    while _vmem_estimate(tile_m) > budget and tile_m > pack:
        new_tile = max(pack, ((tile_m // 2) // pack) * pack)
        if new_tile == tile_m:
            break
        tile_m = new_tile

    num_tiles = pl.cdiv(M, tile_m)

    if vmem_limit_bytes is None:
        vmem_limit_bytes = min(max(2 * _vmem_estimate(tile_m), 32 << 20), 64 << 20)

    kernel = partial(_triplet_att_kernel, alpha=float(alpha), gamma=g,
                     inv_eps=1.0 / float(eps), n_pos=Np, total_rows=M)

    grid_spec = pltpu.PrefetchScalarGridSpec(
        num_scalar_prefetch=0,
        grid=(num_tiles,),
        in_specs=[
            pl.BlockSpec((tile_m, D), lambda i: (i, 0)),        # utt_pos row tile
            pl.BlockSpec((tile_m, D), lambda i: (i, 0)),        # utt_neg row tile
            pl.BlockSpec(memory_space=pl.ANY),                  # stacked persona^T (HBM)
            pl.BlockSpec((1, ncat), lambda i: (0, 0)),          # persona inverse norms
        ],
        out_specs=pl.BlockSpec(memory_space=pltpu.SMEM),        # scalar loss
        scratch_shapes=[
            pltpu.VMEM((D, ncat), per_cat_t.dtype),             # persona copy (1x)
            pltpu.VMEM((1, ncat), jnp.float32),                 # sum e   (pos LHS)
            pltpu.VMEM((1, ncat), jnp.float32),                 # sum e*s (pos LHS)
            pltpu.VMEM((1, ncat), jnp.float32),                 # sum e   (neg LHS)
            pltpu.VMEM((1, ncat), jnp.float32),                 # sum e*s (neg LHS)
        ],
    )

    out = pl.pallas_call(
        kernel,
        out_shape=jax.ShapeDtypeStruct((1, 1), jnp.float32),
        grid_spec=grid_spec,
        compiler_params=pltpu.CompilerParams(
            dimension_semantics=("arbitrary",),                 # accumulation axis
            vmem_limit_bytes=int(vmem_limit_bytes)),
    )(utt_pos, utt_neg, per_cat_t, inv_p)
    return out[0, 0]


def _reference(utt_pos, per_pos, utt_neg, per_neg, alpha=0.2, gamma=1.0, eps=1e-6):
    def cos(a, b):
        wa = jnp.linalg.norm(a, axis=1, keepdims=True)
        wb = jnp.linalg.norm(b, axis=1, keepdims=True)
        return (a @ b.T) / jnp.maximum(wa * wb.T, eps)

    def att(s):
        e = jnp.exp(gamma * s)
        return jnp.sum((e / jnp.sum(e)) * s)

    p2p_l = att(cos(utt_pos, per_pos))
    n2p_l = att(cos(utt_neg, per_pos))
    p2n_l = att(cos(utt_pos, per_neg))
    return (jnp.maximum(0.0, alpha - p2p_l + n2p_l)
            + jnp.maximum(0.0, alpha - p2p_l + p2n_l))


if __name__ == "__main__":
    key = jax.random.PRNGKey(0)
    k1, k2, k3, k4, k5, k6, k7, k8 = jax.random.split(key, 8)

    # Tolerance covers the f32-on-MXU matmul (bf16-pass) in the kernel vs the
    # XLA-default reference matmul; the epilogue itself uses exact division.
    TOL = 2e-3

    # --- test 1: single-tile path (demo shape), att_soft -----------------------
    M, N, D = 8, 8, 32   # (num_utterances, num_personas, hidden)
    utt_pos = jax.random.normal(k1, (M, D), dtype=jnp.float32)
    per_pos = jax.random.normal(k2, (N, D), dtype=jnp.float32)
    utt_neg = jax.random.normal(k3, (M, D), dtype=jnp.float32)
    per_neg = jax.random.normal(k4, (N, D), dtype=jnp.float32)

    loss = triplet_att_loss(utt_pos, per_pos, utt_neg, per_neg,
                            att_type="att_soft", alpha=0.2)
    loss = jax.block_until_ready(loss)
    ref = _reference(utt_pos, per_pos, utt_neg, per_neg, alpha=0.2, gamma=1.0)
    assert jnp.allclose(loss, ref, atol=TOL, rtol=TOL), (loss, ref)

    # --- test 2: multi-tile streaming path with a ragged last tile -------------
    M2, Np2, Nn2, D2 = 20, 16, 24, 32
    u_pos2 = jax.random.normal(k5, (M2, D2), dtype=jnp.float32)
    p_pos2 = jax.random.normal(k6, (Np2, D2), dtype=jnp.float32)
    u_neg2 = jax.random.normal(k7, (M2, D2), dtype=jnp.float32)
    p_neg2 = jax.random.normal(k8, (Nn2, D2), dtype=jnp.float32)

    loss2 = triplet_att_loss(u_pos2, p_pos2, u_neg2, p_neg2,
                             att_type="att_soft", alpha=0.2, row_tile=8)
    loss2 = jax.block_until_ready(loss2)
    ref2 = _reference(u_pos2, p_pos2, u_neg2, p_neg2, alpha=0.2, gamma=1.0)
    assert jnp.allclose(loss2, ref2, atol=TOL, rtol=TOL), (loss2, ref2)

    # --- test 3: att_sharp (gamma != 1) ----------------------------------------
    loss3 = triplet_att_loss(utt_pos, per_pos, utt_neg, per_neg,
                             att_type="att_sharp", alpha=0.2, gamma=2.0)
    loss3 = jax.block_until_ready(loss3)
    ref3 = _reference(utt_pos, per_pos, utt_neg, per_neg, alpha=0.2, gamma=2.0)
    assert jnp.allclose(loss3, ref3, atol=TOL, rtol=TOL), (loss3, ref3)

    print("KERNEL_OK")
</pallas_src>

<mosaic_0001>
module attributes {stable_mosaic.version = 11 : i64} {
  func.func @_triplet_att_kernel(%arg0: i32, %arg1: memref<8x32xf32, #tpu.memory_space<vmem>>, %arg2: memref<8x32xf32, #tpu.memory_space<vmem>>, %arg3: memref<32x16xf32, #tpu.memory_space<any>>, %arg4: memref<1x16xf32, #tpu.memory_space<vmem>>, %arg5: memref<1x1xf32, #tpu.memory_space<smem>>, %arg6: memref<32x16xf32, #tpu.memory_space<vmem>>, %arg7: memref<1x16xf32, #tpu.memory_space<vmem>>, %arg8: memref<1x16xf32, #tpu.memory_space<vmem>>, %arg9: memref<1x16xf32, #tpu.memory_space<vmem>>, %arg10: memref<1x16xf32, #tpu.memory_space<vmem>>) attributes {dimension_semantics = [#tpu.dimension_semantics<arbitrary>], iteration_bounds = array<i64: 1>, scalar_prefetch = 0 : i64, scratch_operands = 5 : i64, tpu.core_type = #tpu.core_type<tc>, window_params = [{transform_indices = @transform_0, window_bounds = array<i64: 8, 32>}, {transform_indices = @transform_1, window_bounds = array<i64: 8, 32>}, {}, {pipeline_mode = #tpu.pipeline_mode<synchronous>, transform_indices = @transform_3, window_bounds = array<i64: 1, 16>}, {transform_indices = @transform_4, window_bounds = array<i64: 1, 1>}]} {
    %c0_i32 = arith.constant 0 : i32
    %0 = arith.cmpi eq, %arg0, %c0_i32 : i32
    %1 = arith.extui %0 : i1 to i32
    %c0_i32_0 = arith.constant 0 : i32
    %2 = arith.cmpi ne, %1, %c0_i32_0 : i32
    scf.if %2 {
      "tpu.region"() ({
        %64 = tpu.sem_alloc : memref<!tpu.dma_semaphore, #tpu.memory_space<semaphore_mem>>
        tpu.enqueue_dma source(%arg3 : memref<32x16xf32, #tpu.memory_space<any>>) target(%arg6 : memref<32x16xf32, #tpu.memory_space<vmem>>) target_semaphore(%64 : memref<!tpu.dma_semaphore, #tpu.memory_space<semaphore_mem>>)
        tpu.wait_dma2 semaphore(%64 : memref<!tpu.dma_semaphore, #tpu.memory_space<semaphore_mem>>) src(%arg3 : memref<32x16xf32, #tpu.memory_space<any>>) dst(%arg6 : memref<32x16xf32, #tpu.memory_space<vmem>>)
        tpu.yield
      }) : () -> ()
      %cst_35 = arith.constant 0.000000e+00 : f32
      %56 = vector.broadcast %cst_35 : f32 to vector<1x16xf32>
      %c0_36 = arith.constant 0 : index
      %c0_37 = arith.constant 0 : index
      %57 = vector.load %arg7[%c0_36, %c0_37] : memref<1x16xf32, #tpu.memory_space<vmem>>, vector<1x16xf32>
      tpu.vector_store %arg7[%c0_36, %c0_37], %56 {strides = array<i32>} : memref<1x16xf32, #tpu.memory_space<vmem>>, vector<1x16xf32>,
      %cst_38 = arith.constant 0.000000e+00 : f32
      %58 = vector.broadcast %cst_38 : f32 to vector<1x16xf32>
      %c0_39 = arith.constant 0 : index
      %c0_40 = arith.constant 0 : index
      %59 = vector.load %arg8[%c0_39, %c0_40] : memref<1x16xf32, #tpu.memory_space<vmem>>, vector<1x16xf32>
      tpu.vector_store %arg8[%c0_39, %c0_40], %58 {strides = array<i32>} : memref<1x16xf32, #tpu.memory_space<vmem>>, vector<1x16xf32>,
      %cst_41 = arith.constant 0.000000e+00 : f32
      %60 = vector.broadcast %cst_41 : f32 to vector<1x16xf32>
      %c0_42 = arith.constant 0 : index
      %c0_43 = arith.constant 0 : index
      %61 = vector.load %arg9[%c0_42, %c0_43] : memref<1x16xf32, #tpu.memory_space<vmem>>, vector<1x16xf32>
      tpu.vector_store %arg9[%c0_42, %c0_43], %60 {strides = array<i32>} : memref<1x16xf32, #tpu.memory_space<vmem>>, vector<1x16xf32>,
      %cst_44 = arith.constant 0.000000e+00 : f32
      %62 = vector.broadcast %cst_44 : f32 to vector<1x16xf32>
      %c0_45 = arith.constant 0 : index
      %c0_46 = arith.constant 0 : index
      %63 = vector.load %arg10[%c0_45, %c0_46] : memref<1x16xf32, #tpu.memory_space<vmem>>, vector<1x16xf32>
      tpu.vector_store %arg10[%c0_45, %c0_46], %62 {strides = array<i32>} : memref<1x16xf32, #tpu.memory_space<vmem>>, vector<1x16xf32>,
    } else {
    }
    %c0 = arith.constant 0 : index
    %c0_1 = arith.constant 0 : index
    %3 = vector.load %arg1[%c0, %c0_1] : memref<8x32xf32, #tpu.memory_space<vmem>>, vector<8x32xf32>
    %c0_2 = arith.constant 0 : index
    %c0_3 = arith.constant 0 : index
    %4 = vector.load %arg2[%c0_2, %c0_3] : memref<8x32xf32, #tpu.memory_space<vmem>>, vector<8x32xf32>
    %5 = arith.mulf %3, %3 : vector<8x32xf32>
    %cst = arith.constant dense<0.000000e+00> : vector<8xf32>
    %6 = vector.multi_reduction <add>, %5, %cst [1] : vector<8x32xf32> to vector<8xf32>
    %7 = vector.shape_cast %6 : vector<8xf32> to vector<8x1xf32>
    %8 = math.rsqrt %7 : vector<8x1xf32>
    %9 = arith.mulf %4, %4 : vector<8x32xf32>
    %cst_4 = arith.constant dense<0.000000e+00> : vector<8xf32>
    %10 = vector.multi_reduction <add>, %9, %cst_4 [1] : vector<8x32xf32> to vector<8xf32>
    %11 = vector.shape_cast %10 : vector<8xf32> to vector<8x1xf32>
    %12 = math.rsqrt %11 : vector<8x1xf32>
    %c0_5 = arith.constant 0 : index
    %c0_6 = arith.constant 0 : index
    %13 = vector.load %arg6[%c0_5, %c0_6] : memref<32x16xf32, #tpu.memory_space<vmem>>, vector<32x16xf32>
    %c0_7 = arith.constant 0 : index
    %c0_8 = arith.constant 0 : index
    %14 = vector.load %arg4[%c0_7, %c0_8] : memref<1x16xf32, #tpu.memory_space<vmem>>, vector<1x16xf32>
    %cst_9 = arith.constant dense<0.000000e+00> : vector<8x16xf32>
    %15 = tpu.matmul %3, %13, %cst_9 {dimension_numbers = #tpu.dot_dimension_numbers<[1], [0], [0], [1], [0, 0, 1, 1], [], []>} : vector<8x32xf32>, vector<32x16xf32>, vector<8x16xf32> -> vector<8x16xf32>
    %cst_10 = arith.constant dense<0.000000e+00> : vector<8x16xf32>
    %16 = tpu.matmul %4, %13, %cst_10 {dimension_numbers = #tpu.dot_dimension_numbers<[1], [0], [0], [1], [0, 0, 1, 1], [], []>} : vector<8x32xf32>, vector<32x16xf32>, vector<8x16xf32> -> vector<8x16xf32>
    %17 = vector.broadcast %8 : vector<8x1xf32> to vector<8x16xf32>
    %18 = vector.broadcast %14 : vector<1x16xf32> to vector<8x16xf32>
    %19 = arith.mulf %17, %18 : vector<8x16xf32>
    %cst_11 = arith.constant 1.000000e+06 : f32
    %20 = vector.broadcast %cst_11 : f32 to vector<8x16xf32>
    %21 = arith.minimumf %19, %20 : vector<8x16xf32>
    %22 = arith.mulf %15, %21 : vector<8x16xf32>
    %23 = vector.broadcast %12 : vector<8x1xf32> to vector<8x16xf32>
    %24 = vector.broadcast %14 : vector<1x16xf32> to vector<8x16xf32>
    %25 = arith.mulf %23, %24 : vector<8x16xf32>
    %cst_12 = arith.constant 1.000000e+06 : f32
    %26 = vector.broadcast %cst_12 : f32 to vector<8x16xf32>
    %27 = arith.minimumf %25, %26 : vector<8x16xf32>
    %28 = arith.mulf %16, %27 : vector<8x16xf32>
    %29 = math.exp %22 : vector<8x16xf32>
    %30 = math.exp %28 : vector<8x16xf32>
    %31 = arith.mulf %29, %22 : vector<8x16xf32>
    %32 = arith.mulf %30, %28 : vector<8x16xf32>
    %c0_13 = arith.constant 0 : index
    %c0_14 = arith.constant 0 : index
    %33 = vector.load %arg7[%c0_13, %c0_14] : memref<1x16xf32, #tpu.memory_space<vmem>>, vector<1x16xf32>
    %cst_15 = arith.constant dense<0.000000e+00> : vector<16xf32>
    %34 = vector.multi_reduction <add>, %29, %cst_15 [0] : vector<8x16xf32> to vector<16xf32>
    %35 = vector.shape_cast %34 : vector<16xf32> to vector<1x16xf32>
    %36 = arith.addf %33, %35 : vector<1x16xf32>
    %c0_16 = arith.constant 0 : index
    %c0_17 = arith.constant 0 : index
    %37 = vector.load %arg7[%c0_16, %c0_17] : memref<1x16xf32, #tpu.memory_space<vmem>>, vector<1x16xf32>
    tpu.vector_store %arg7[%c0_16, %c0_17], %36 {strides = array<i32>} : memref<1x16xf32, #tpu.memory_space<vmem>>, vector<1x16xf32>,
    %c0_18 = arith.constant 0 : index
    %c0_19 = arith.constant 0 : index
    %38 = vector.load %arg8[%c0_18, %c0_19] : memref<1x16xf32, #tpu.memory_space<vmem>>, vector<1x16xf32>
    %cst_20 = arith.constant dense<0.000000e+00> : vector<16xf32>
    %39 = vector.multi_reduction <add>, %31, %cst_20 [0] : vector<8x16xf32> to vector<16xf32>
    %40 = vector.shape_cast %39 : vector<16xf32> to vector<1x16xf32>
    %41 = arith.addf %38, %40 : vector<1x16xf32>
    %c0_21 = arith.constant 0 : index
    %c0_22 = arith.constant 0 : index
    %42 = vector.load %arg8[%c0_21, %c0_22] : memref<1x16xf32, #tpu.memory_space<vmem>>, vector<1x16xf32>
    tpu.vector_store %arg8[%c0_21, %c0_22], %41 {strides = array<i32>} : memref<1x16xf32, #tpu.memory_space<vmem>>, vector<1x16xf32>,
    %c0_23 = arith.constant 0 : index
    %c0_24 = arith.constant 0 : index
    %43 = vector.load %arg9[%c0_23, %c0_24] : memref<1x16xf32, #tpu.memory_space<vmem>>, vector<1x16xf32>
    %cst_25 = arith.constant dense<0.000000e+00> : vector<16xf32>
    %44 = vector.multi_reduction <add>, %30, %cst_25 [0] : vector<8x16xf32> to vector<16xf32>
    %45 = vector.shape_cast %44 : vector<16xf32> to vector<1x16xf32>
    %46 = arith.addf %43, %45 : vector<1x16xf32>
    %c0_26 = arith.constant 0 : index
    %c0_27 = arith.constant 0 : index
    %47 = vector.load %arg9[%c0_26, %c0_27] : memref<1x16xf32, #tpu.memory_space<vmem>>, vector<1x16xf32>
    tpu.vector_store %arg9[%c0_26, %c0_27], %46 {strides = array<i32>} : memref<1x16xf32, #tpu.memory_space<vmem>>, vector<1x16xf32>,
    %c0_28 = arith.constant 0 : index
    %c0_29 = arith.constant 0 : index
    %48 = vector.load %arg10[%c0_28, %c0_29] : memref<1x16xf32, #tpu.memory_space<vmem>>, vector<1x16xf32>
    %cst_30 = arith.constant dense<0.000000e+00> : vector<16xf32>
    %49 = vector.multi_reduction <add>, %32, %cst_30 [0] : vector<8x16xf32> to vector<16xf32>
    %50 = vector.shape_cast %49 : vector<16xf32> to vector<1x16xf32>
    %51 = arith.addf %48, %50 : vector<1x16xf32>
    %c0_31 = arith.constant 0 : index
    %c0_32 = arith.constant 0 : index
    %52 = vector.load %arg10[%c0_31, %c0_32] : memref<1x16xf32, #tpu.memory_space<vmem>>, vector<1x16xf32>
    tpu.vector_store %arg10[%c0_31, %c0_32], %51 {strides = array<i32>} : memref<1x16xf32, #tpu.memory_space<vmem>>, vector<1x16xf32>,
    %c0_i32_33 = arith.constant 0 : i32
    %53 = arith.cmpi eq, %arg0, %c0_i32_33 : i32
    %54 = arith.extui %53 : i1 to i32
    %c0_i32_34 = arith.constant 0 : i32
    %55 = arith.cmpi ne, %54, %c0_i32_34 : i32
    scf.if %55 {
      %56 = tpu.iota {dimensions = array<i32: 1>} : vector<1x16xi32>
      %c8_i32 = arith.constant 8 : i32
      %57 = vector.broadcast %c8_i32 : i32 to vector<1x16xi32>
      %58 = arith.cmpi slt, %56, %57 : vector<1x16xi32>
      %c0_35 = arith.constant 0 : index
      %c0_36 = arith.constant 0 : index
      %59 = vector.load %arg7[%c0_35, %c0_36] : memref<1x16xf32, #tpu.memory_space<vmem>>, vector<1x16xf32>
      %c0_37 = arith.constant 0 : index
      %c0_38 = arith.constant 0 : index
      %60 = vector.load %arg8[%c0_37, %c0_38] : memref<1x16xf32, #tpu.memory_space<vmem>>, vector<1x16xf32>
      %c0_39 = arith.constant 0 : index
      %c0_40 = arith.constant 0 : index
      %61 = vector.load %arg9[%c0_39, %c0_40] : memref<1x16xf32, #tpu.memory_space<vmem>>, vector<1x16xf32>
      %c0_41 = arith.constant 0 : index
      %c0_42 = arith.constant 0 : index
      %62 = vector.load %arg10[%c0_41, %c0_42] : memref<1x16xf32, #tpu.memory_space<vmem>>, vector<1x16xf32>
      %cst_43 = arith.constant 0.000000e+00 : f32
      %63 = vector.broadcast %cst_43 : f32 to vector<1x16xf32>
      %64 = arith.select %58, %59, %63 : vector<1x16xi1>, vector<1x16xf32>
      %65 = vector.shape_cast %64 : vector<1x16xf32> to vector<1x1x16xf32>
      %cst_44 = arith.constant dense<0.000000e+00> : vector<1xf32>
      %66 = vector.multi_reduction <add>, %65, %cst_44 [1, 2] : vector<1x1x16xf32> to vector<1xf32>
      %67 = vector.shape_cast %66 : vector<1xf32> to vector<1x1x1xf32>
      %68 = vector.extract %67[0, 0, 0] : f32 from vector<1x1x1xf32>
      %cst_45 = arith.constant 0.000000e+00 : f32
      %69 = vector.broadcast %cst_45 : f32 to vector<1x16xf32>
      %70 = arith.select %58, %60, %69 : vector<1x16xi1>, vector<1x16xf32>
      %71 = vector.shape_cast %70 : vector<1x16xf32> to vector<1x1x16xf32>
      %cst_46 = arith.constant dense<0.000000e+00> : vector<1xf32>
      %72 = vector.multi_reduction <add>, %71, %cst_46 [1, 2] : vector<1x1x16xf32> to vector<1xf32>
      %73 = vector.shape_cast %72 : vector<1xf32> to vector<1x1x1xf32>
      %74 = vector.extract %73[0, 0, 0] : f32 from vector<1x1x1xf32>
      %cst_47 = arith.constant 0.000000e+00 : f32
      %75 = vector.broadcast %cst_47 : f32 to vector<1x16xf32>
      %76 = arith.select %58, %75, %59 : vector<1x16xi1>, vector<1x16xf32>
      %77 = vector.shape_cast %76 : vector<1x16xf32> to vector<1x1x16xf32>
      %cst_48 = arith.constant dense<0.000000e+00> : vector<1xf32>
      %78 = vector.multi_reduction <add>, %77, %cst_48 [1, 2] : vector<1x1x16xf32> to vector<1xf32>
      %79 = vector.shape_cast %78 : vector<1xf32> to vector<1x1x1xf32>
      %80 = vector.extract %79[0, 0, 0] : f32 from vector<1x1x1xf32>
      %cst_49 = arith.constant 0.000000e+00 : f32
      %81 = vector.broadcast %cst_49 : f32 to vector<1x16xf32>
      %82 = arith.select %58, %81, %60 : vector<1x16xi1>, vector<1x16xf32>
      %83 = vector.shape_cast %82 : vector<1x16xf32> to vector<1x1x16xf32>
      %cst_50 = arith.constant dense<0.000000e+00> : vector<1xf32>
      %84 = vector.multi_reduction <add>, %83, %cst_50 [1, 2] : vector<1x1x16xf32> to vector<1xf32>
      %85 = vector.shape_cast %84 : vector<1xf32> to vector<1x1x1xf32>
      %86 = vector.extract %85[0, 0, 0] : f32 from vector<1x1x1xf32>
      %cst_51 = arith.constant 0.000000e+00 : f32
      %87 = vector.broadcast %cst_51 : f32 to vector<1x16xf32>
      %88 = arith.select %58, %61, %87 : vector<1x16xi1>, vector<1x16xf32>
      %89 = vector.shape_cast %88 : vector<1x16xf32> to vector<1x1x16xf32>
      %cst_52 = arith.constant dense<0.000000e+00> : vector<1xf32>
      %90 = vector.multi_reduction <add>, %89, %cst_52 [1, 2] : vector<1x1x16xf32> to vector<1xf32>
      %91 = vector.shape_cast %90 : vector<1xf32> to vector<1x1x1xf32>
      %92 = vector.extract %91[0, 0, 0] : f32 from vector<1x1x1xf32>
      %cst_53 = arith.constant 0.000000e+00 : f32
      %93 = vector.broadcast %cst_53 : f32 to vector<1x16xf32>
      %94 = arith.select %58, %62, %93 : vector<1x16xi1>, vector<1x16xf32>
      %95 = vector.shape_cast %94 : vector<1x16xf32> to vector<1x1x16xf32>
      %cst_54 = arith.constant dense<0.000000e+00> : vector<1xf32>
      %96 = vector.multi_reduction <add>, %95, %cst_54 [1, 2] : vector<1x1x16xf32> to vector<1xf32>
      %97 = vector.shape_cast %96 : vector<1xf32> to vector<1x1x1xf32>
      %98 = vector.extract %97[0, 0, 0] : f32 from vector<1x1x1xf32>
      %99 = arith.divf %74, %68 : f32
      %100 = arith.divf %98, %92 : f32
      %101 = arith.divf %86, %80 : f32
      %cst_55 = arith.constant 2.000000e-01 : f32
      %102 = arith.subf %cst_55, %99 : f32
      %103 = arith.addf %102, %100 : f32
      %cst_56 = arith.constant 0.000000e+00 : f32
      %104 = arith.maximumf %cst_56, %103 : f32
      %cst_57 = arith.constant 2.000000e-01 : f32
      %105 = arith.subf %cst_57, %99 : f32
      %106 = arith.addf %105, %101 : f32
      %cst_58 = arith.constant 0.000000e+00 : f32
      %107 = arith.maximumf %cst_58, %106 : f32
      %108 = arith.addf %104, %107 : f32
      %c0_59 = arith.constant 0 : index
      %c0_60 = arith.constant 0 : index
      %109 = memref.load %arg5[%c0_59, %c0_60] : memref<1x1xf32, #tpu.memory_space<smem>>
      memref.store %108, %arg5[%c0_59, %c0_60] : memref<1x1xf32, #tpu.memory_space<smem>>
    } else {
    }
    return
  }
  func.func @transform_0(%arg0: i32) -> (i32, i32) {
    %c0_i32 = arith.constant 0 : i32
    %c0_i32_0 = arith.constant 0 : i32
    return %arg0, %c0_i32 : i32, i32
  }
  func.func @transform_1(%arg0: i32) -> (i32, i32) {
    %c0_i32 = arith.constant 0 : i32
    %c0_i32_0 = arith.constant 0 : i32
    return %arg0, %c0_i32 : i32, i32
  }
  func.func @transform_3(%arg0: i32) -> (i32, i32) {
    %c0_i32 = arith.constant 0 : i32
    %c0_i32_0 = arith.constant 0 : i32
    %c0_i32_1 = arith.constant 0 : i32
    return %c0_i32, %c0_i32_0 : i32, i32
  }
  func.func @transform_4(%arg0: i32) -> (i32, i32) {
    %c0_i32 = arith.constant 0 : i32
    %c0_i32_0 = arith.constant 0 : i32
    %c0_i32_1 = arith.constant 0 : i32
    return %c0_i32, %c0_i32_0 : i32, i32
  }
}

</mosaic_0001>

<bundles_post_ra>
// kernel: tpu_custom_call.1
= control target key start
LH: loop header
LB: loop body
LE: loop exit
PB: predicated region body
PF: predicated region fallthrough
CT: control target
= control target key end

     0   :  { %9 = vsyncpa [#allocation8], 0  ;;  %s485_s0 = inlined_call_operand.vmem [shape: f32[8,32], index: 0, kind: input, shape index: {}]   ;;  %s486_s1 = inlined_call_operand.vmem [shape: f32[8,32], index: 1, kind: input, shape index: {}]   ;;  %s487_s2 = inlined_call_operand.vmem [shape: f32[32,16], index: 2, kind: input, shape index: {}]   ;;  %s488_s3 = inlined_call_operand.vmem [shape: f32[1,16], index: 3, kind: input, shape index: {}]   ;;  %s489_s4 = inlined_call_operand.hbm [shape: f32[1,1], index: 4, kind: output, shape index: {}]  }
   0x1   :  { %v30_v0 = vld [vmem:[%s487_s2] sm:$0xff]  ;;  %v32_v1 = vld [vmem:[%s487_s2 + $0x8] sm:$0xff]  ;;  %v34_v2 = vld [vmem:[%s487_s2 + $0x10] sm:$0xff] }
   0x2   :  { %v36_v3 = vld [vmem:[%s487_s2 + $0x18] sm:$0xff] }
   0x3   :  { %43 = vsyncadd [#allocation9], 512 }
   0x4   :  { %395 = dma.done.wait [#allocation9], 512 }
   0x5   :  { %396 = vsyncadd [#allocation9], 4294966784  ;;  %v52_v4 = vld [vmem:[%s485_s0] sm:$0xff]  ;;  %vm55_vm0 = vcmask 261120   ;;  %103 = vmatpush.msra.mxu0 %v36_v3  ;;  %126 = vmatpush.msra.mxu1 %v36_v3  ;;  %vm47_vm1 = vcmask 122880   ;;  %v399_v10 = vmov 0.0   ;;  %v194_v62 = vlaneseq }
   0x6   :  { %v54_v5 = vmul.f32 %v52_v4, %v52_v4  ;;  %v53_v6 = vld [vmem:[%s486_s1] sm:$0xff]  ;;  %48 = vst.msk [vmem:[#allocation3] sm:$0x1] %vm47_vm1, %v399_v10  ;;  %vm150_vm8 = vcmask 130048   ;;  %s331_s15 = sshll.u32 %s489_s4, 4  ;;  %s400_s17 = smov 0.0   ;;  %s332_s15 = int_to_ptr.hbm [resolvable:$true] %s331_s15 }
   0x7   :  { %104 = vmatpush.msra.mxu0 %v34_v2  ;;  %127 = vmatpush.msra.mxu1 %v34_v2  ;;  %v69_v8 = vmul.f32 %v53_v6, %v53_v6  ;;  %49 = vst.msk [vmem:[#allocation4] sm:$0x1] %vm47_vm1, %v399_v10  ;;  %v368_v19 = vld [vmem:[%s488_s3] ss:$0 sm:$0xff]  ;;  %s401_s21 = smov [#allocation7]  }
   0x8   :  { %v56_v7 = vsel %vm55_vm0, %v54_v5, 0.0  ;;  %50 = vst.msk [vmem:[#allocation5] sm:$0x1] %vm47_vm1, %v399_v10 }
   0x9   :  { %57 = vadd.xlane.f32.xlu0 %v56_v7  ;;  %105 = vmatpush.msra.mxu0 %v32_v1  ;;  %v70_v9 = vsel %vm55_vm0, %v69_v8, 0.0  ;;  %51 = vst.msk [vmem:[#allocation6] sm:$0x1] %vm47_vm1, %v399_v10 }
   0xa   :  { %128 = vmatpush.msra.mxu1 %v32_v1 }
   0xb   :  { %106 = vmatpush.msra.mxu0 %v30_v0 }
   0xc   :  { %345 = vmatmul.msk.f32.vlgmr.msra.gmra.mxu0 %vm55_vm0, %v52_v4  ;;  %129 = vmatpush.msra.mxu1 %v30_v0 }
   0xd   :  { %346 = vmatmul.msk.f32.vlgmr.msra.gmra.mxu1 %vm55_vm0, %v53_v6  ;;  %v149_v55 = vld [vmem:[#allocation3] sm:$0x1]  ;;  %v195_v6 = vand.u32 127, %v194_v62 }
   0xe   :  { %v161_v61 = vld [vmem:[#allocation4] sm:$0x1] }
   0xf   :  { %vm196_vm9 = vcmp.lt.s32.totalorder %v195_v6, 8 }
  0x11   :  { %71 = vadd.xlane.f32.xlu0 %v70_v9  ;;  %v171_v9 = vld [vmem:[#allocation5] sm:$0x1] }
  0x7c   :  { %v58_v11 = vpop.xlane.xlu0 %57 }
  0x7d   :  { %369 = vrsqrt.f32 %v58_v11  ;;  %vm65_vm3 = vweird.f32 %v58_v11 }
  0x83   :  { %v370_v12 = vpop.eup %369 }
  0x84   :  { %v60_v13 = vmul.f32 %v370_v12, %v58_v11  ;;  %v72_v14 = vpop.xlane.xlu0 %71  ;;  %vm66_vm2 = vweird.f32 %v370_v12 }
  0x85   :  { %371 = vrsqrt.f32 %v72_v14  ;;  %vm67_vm4 = vmor %vm65_vm3, %vm66_vm2  ;;  %vm79_vm6 = vweird.f32 %v72_v14 }
  0x86   :  { %v61_v15 = vmul.f32 %v370_v12, %v60_v13 }
  0x88   :  { %v62_v16 = vmul.f32 0.5, %v61_v15 }
  0x89   :  { %v108_v26 = vpop.f32.mrf.mxu0 }
  0x8a   :  { %v63_v17 = vsub.f32 1.5, %v62_v16  ;;  %v131_v34 = vpop.f32.mrf.mxu1 }
  0x8b   :  { %v372_v18 = vpop.eup %371 }
  0x8c   :  { %v74_v20 = vmul.f32 %v372_v18, %v72_v14  ;;  %v64_v21 = vmul.f32 %v370_v12, %v63_v17  ;;  %vm80_vm5 = vweird.f32 %v372_v18 }
  0x8d   :  { %vm81_vm7 = vmor %vm79_vm6, %vm80_vm5 }
  0x8e   :  { %v75_v22 = vmul.f32 %v372_v18, %v74_v20  ;;  %v68_v23 = vsel %vm67_vm4, %v370_v12, %v64_v21  ;;  %v181_v12 = vld [vmem:[#allocation6] sm:$0x1] }
  0x8f   :  { %v137_v24 = vmul.f32 %v368_v19, %v68_v23 }
  0x90   :  { %v76_v25 = vmul.f32 0.5, %v75_v22 }
  0x91   :  { %v138_v27 = vmin.f32 %v137_v24, 1000000.0 }
  0x92   :  { %v77_v28 = vsub.f32 1.5, %v76_v25 }
  0x93   :  { %v139_v29 = vmul.f32 %v138_v27, %v108_v26 }
  0x94   :  { %v78_v30 = vmul.f32 %v372_v18, %v77_v28 }
  0x95   :  { %v143_v31 = vmul.f32 1.442695, %v139_v29 }
  0x96   :  { %v82_v32 = vsel %vm81_vm7, %v372_v18, %v78_v30 }
  0x97   :  { %373 = vpow2.f32 %v143_v31  ;;  %v140_v33 = vmul.f32 %v368_v19, %v82_v32 }
  0x99   :  { %v141_v35 = vmin.f32 %v140_v33, 1000000.0 }
  0x9b   :  { %v142_v36 = vmul.f32 %v141_v35, %v131_v34 }
  0x9d   :  { %v374_v37 = vpop.eup %373  ;;  %v145_v38 = vmul.f32 1.442695, %v142_v36 }
  0x9e   :  { %v147_v39 = vmul.f32 %v374_v37, %v139_v29  ;;  %v151_v40 = vsel %vm150_vm8, %v374_v37, 0.0 }
  0x9f   :  { %v152_v41 = vrot.slane %v151_v40, 4  ;;  %375 = vpow2.f32 %v145_v38 }
  0xa0   :  { %v162_v42 = vsel %vm150_vm8, %v147_v39, 0.0 }
  0xa1   :  { %v153_v43 = vadd.f32 %v152_v41, %v151_v40  ;;  %v163_v44 = vrot.slane %v162_v42, 4 }
  0xa3   :  { %v154_v45 = vrot.slane %v153_v43, 2  ;;  %v164_v46 = vadd.f32 %v163_v44, %v162_v42 }
  0xa5   :  { %v376_v47 = vpop.eup %375  ;;  %v155_v48 = vadd.f32 %v154_v45, %v153_v43  ;;  %v165_v49 = vrot.slane %v164_v46, 2 }
  0xa6   :  { %v148_v50 = vmul.f32 %v376_v47, %v142_v36  ;;  %v172_v51 = vsel %vm150_vm8, %v376_v47, 0.0 }
  0xa7   :  { %v156_v52 = vrot.slane %v155_v48, 1  ;;  %v166_v53 = vadd.f32 %v165_v49, %v164_v46  ;;  %v173_v54 = vrot.slane %v172_v51, 4 }
  0xa8   :  { %v182_v56 = vsel %vm150_vm8, %v148_v50, 0.0 }
  0xa9   :  { %v157_v57 = vadd.f32 %v156_v52, %v155_v48  ;;  %v167_v58 = vrot.slane %v166_v53, 1  ;;  %v174_v59 = vadd.f32 %v173_v54, %v172_v51  ;;  %v183_v60 = vrot.slane %v182_v56, 4 }
  0xab   :  { %v158_v63 = vadd.f32 %v157_v57, %v149_v55  ;;  %v168_v0 = vadd.f32 %v167_v58, %v166_v53  ;;  %v175_v1 = vrot.slane %v174_v59, 2  ;;  %v184_v2 = vadd.f32 %v183_v60, %v182_v56 }
  0xad   :  { %160 = vst.msk [vmem:[#allocation3] sm:$0x1] %vm47_vm1, %v158_v63  ;;  %v169_v3 = vadd.f32 %v168_v0, %v161_v61  ;;  %v176_v4 = vadd.f32 %v175_v1, %v174_v59  ;;  %v185_v5 = vrot.slane %v184_v2, 2 }
  0xaf   :  { %170 = vst.msk [vmem:[#allocation4] sm:$0x1] %vm47_vm1, %v169_v3  ;;  %v177_v7 = vrot.slane %v176_v4, 1  ;;  %v186_v8 = vadd.f32 %v185_v5, %v184_v2 }
  0xb1   :  { %v178_v10 = vadd.f32 %v177_v7, %v176_v4  ;;  %v187_v11 = vrot.slane %v186_v8, 1 }
  0xb3   :  { %v179_v13 = vadd.f32 %v178_v10, %v171_v9  ;;  %v188_v14 = vadd.f32 %v187_v11, %v186_v8 }
  0xb4   :  { %v197_v15 = vld [vmem:[#allocation3] sm:$0x1] }
  0xb5   :  { %180 = vst.msk [vmem:[#allocation5] sm:$0x1] %vm47_vm1, %v179_v13  ;;  %v189_v16 = vadd.f32 %v188_v14, %v181_v12  ;;  %v223_v17 = vsel %vm196_vm9, 0.0, %v197_v15  ;;  %v201_v18 = vsel %vm196_vm9, %v197_v15, 0.0 }
  0xb6   :  { %v224_v19 = vsel %vm47_vm1, %v223_v17, 0.0  ;;  %v202_v20 = vsel %vm47_vm1, %v201_v18, 0.0  ;;  %v198_v21 = vld [vmem:[#allocation4] sm:$0x1] }
  0xb7   :  { %190 = vst.msk [vmem:[#allocation6] sm:$0x1] %vm47_vm1, %v189_v16  ;;  %225 = vadd.xlane.f32.xlu2 %v224_v19  ;;  %203 = vadd.xlane.f32.xlu1 %v202_v20  ;;  %v234_v22 = vsel %vm196_vm9, 0.0, %v198_v21  ;;  %v212_v24 = vsel %vm196_vm9, %v198_v21, 0.0 }
  0xb8   :  { %v235_v27 = vsel %vm47_vm1, %v234_v22, 0.0  ;;  %v213_v28 = vsel %vm47_vm1, %v212_v24, 0.0 }
  0xbc   :  { %v199_v23 = vld [vmem:[#allocation5] sm:$0x1] }
  0xbd   :  { %v245_v25 = vsel %vm196_vm9, %v199_v23, 0.0 }
  0xbe   :  { %v246_v26 = vsel %vm47_vm1, %v245_v25, 0.0  ;;  %v200_v29 = vld [vmem:[#allocation6] sm:$0x1] }
  0xbf   :  { %247 = vadd.xlane.f32.xlu0 %v246_v26  ;;  %236 = vadd.xlane.f32.xlu2 %v235_v27  ;;  %v256_v30 = vsel %vm196_vm9, %v200_v29, 0.0 }
  0xc0   :  { %214 = vadd.xlane.f32.xlu1 %v213_v28  ;;  %v257_v31 = vsel %vm47_vm1, %v256_v30, 0.0 }
  0xc8   :  { %258 = vadd.xlane.f32.xlu1 %v257_v31 }
 0x12a   :  { %v226_v32 = vpop.xlane.xlu2 %225  ;;  %v204_v33 = vpop.xlane.xlu1 %203 }
 0x12b   :  { %v227_v34 = vrot.slane %v226_v32, 4  ;;  %v205_v35 = vrot.slane %v204_v33, 4 }
 0x12d   :  { %v206_v36 = vadd.f32 %v205_v35, %v204_v33  ;;  %v228_v37 = vadd.f32 %v227_v34, %v226_v32 }
 0x12f   :  { %v207_v38 = vrot.slane %v206_v36, 2  ;;  %v229_v42 = vrot.slane %v228_v37, 2 }
 0x131   :  { %v208_v39 = vadd.f32 %v207_v38, %v206_v36  ;;  %v230_v54 = vadd.f32 %v229_v42, %v228_v37 }
 0x132   :  { %v248_v40 = vpop.xlane.xlu0 %247  ;;  %v237_v41 = vpop.xlane.xlu2 %236 }
 0x133   :  { %v249_v43 = vrot.slane %v248_v40, 4  ;;  %v238_v44 = vrot.slane %v237_v41, 4  ;;  %v215_v45 = vpop.xlane.xlu1 %214  ;;  %v209_v46 = vrot.slane %v208_v39, 1  ;;  %v231_v60 = vrot.slane %v230_v54, 1 }
 0x134   :  { %v216_v47 = vrot.slane %v215_v45, 4 }
 0x135   :  { %v250_v48 = vadd.f32 %v249_v43, %v248_v40  ;;  %v239_v49 = vadd.f32 %v238_v44, %v237_v41  ;;  %v210_v50 = vadd.f32 %v209_v46, %v208_v39  ;;  %v232_v4 = vadd.f32 %v231_v60, %v230_v54 }
 0x136   :  { %v217_v51 = vadd.f32 %v216_v47, %v215_v45 }
 0x137   :  { %v251_v52 = vrot.slane %v250_v48, 2  ;;  %v240_v53 = vrot.slane %v239_v49, 2  ;;  %347 = vpush %v210_v50 }
 0x138   :  { %v218_v55 = vrot.slane %v217_v51, 2 }
 0x139   :  { %v252_v56 = vadd.f32 %v251_v52, %v250_v48  ;;  %v241_v57 = vadd.f32 %v240_v53, %v239_v49 }
 0x13a   :  { %v219_v58 = vadd.f32 %v218_v55, %v217_v51 }
 0x13b   :  { %v259_v59 = vpop.xlane.xlu1 %258  ;;  %v242_v61 = vrot.slane %v241_v57, 1  ;;  %v253_v62 = vrot.slane %v252_v56, 1 }
 0x13c   :  { %v260_v63 = vrot.slane %v259_v59, 4  ;;  %v220_v0 = vrot.slane %v219_v58, 1 }
 0x13d   :  { %v243_v3 = vadd.f32 %v242_v61, %v241_v57  ;;  %v254_v5 = vadd.f32 %v253_v62, %v252_v56 }
 0x13e   :  { %v261_v1 = vadd.f32 %v260_v63, %v259_v59  ;;  %v221_v2 = vadd.f32 %v220_v0, %v219_v58 }
 0x140   :  { %v262_v6 = vrot.slane %v261_v1, 2  ;;  %349 = vpush %v221_v2 }
 0x141   :  { %351 = vpush %v232_v4 }
 0x142   :  { %v263_v7 = vadd.f32 %v262_v6, %v261_v1  ;;  %353 = vpush %v243_v3 }
 0x143   :  { %355 = vpush %v254_v5 }
 0x144   :  { %v264_v8 = vrot.slane %v263_v7, 1 }
 0x146   :  { %v265_v9 = vadd.f32 %v264_v8, %v263_v7 }
 0x148   :  { %357 = vpush %v265_v9 }
 0x168   :  { %s348_s2 = spop %347 }
 0x169   :  { %v267_v10 = vstv %s348_s2 }
 0x16a   :  { %377 = vrcp.f32 %v267_v10  ;;  %v279_v15 = vand.u32 2147483648, %v267_v10  ;;  %v277_v18 = vand.u32 2147483647, %v267_v10  ;;  %vm273_vm11 = vweird.f32 %v267_v10 }
 0x16c   :  { %v280_v20 = vor.u32 1.1754944e-38, %v279_v15  ;;  %vm278_vm13 = vcmp.eq.f32.partialorder %v277_v18, 8.507059e+37 }
 0x170   :  { %v378_v11 = vpop.eup %377 }
 0x171   :  { %v269_v12 = vmul.f32 %v378_v11, %v267_v10  ;;  %s476_s3 = spop %349  ;;  %vm274_vm10 = vweird.f32 %v378_v11 }
 0x172   :  { %s352_s27 = spop %351  ;;  %vm275_vm12 = vmor %vm273_vm11, %vm274_vm10 }
 0x173   :  { %v270_v13 = vsub.f32 1.0, %v269_v12  ;;  %v301_v14 = vstv %s352_s27  ;;  %s478_s28 = spop %353 }
 0x174   :  { %379 = vrcp.f32 %v301_v14  ;;  %s356_s29 = spop %355  ;;  %v313_v30 = vand.u32 2147483648, %v301_v14  ;;  %vm307_vm15 = vweird.f32 %v301_v14  ;;  %v311_v32 = vand.u32 2147483647, %v301_v14 }
 0x175   :  { %v284_v16 = vstv %s356_s29  ;;  %v271_v17 = vmul.f32 %v378_v11, %v270_v13 }
 0x176   :  { %381 = vrcp.f32 %v284_v16  ;;  %v296_v31 = vand.u32 2147483648, %v284_v16  ;;  %v294_v34 = vand.u32 2147483647, %v284_v16  ;;  %vm290_vm2 = vweird.f32 %v284_v16 }
 0x177   :  { %v272_v19 = vadd.f32 %v378_v11, %v271_v17  ;;  %v314_v38 = vor.u32 1.1754944e-38, %v313_v30  ;;  %vm312_vm4 = vcmp.eq.f32.partialorder %v311_v32, 8.507059e+37 }
 0x178   :  { %v297_v39 = vor.u32 1.1754944e-38, %v296_v31  ;;  %vm295_vm5 = vcmp.eq.f32.partialorder %v294_v34, 8.507059e+37 }
 0x179   :  { %v276_v21 = vsel %vm275_vm12, %v378_v11, %v272_v19  ;;  %s358_s30 = spop %357 }
 0x17a   :  { %v380_v22 = vpop.eup %379  ;;  %v281_v23 = vsel %vm278_vm13, %v280_v20, %v276_v21 }
 0x17b   :  { %v303_v24 = vmul.f32 %v380_v22, %v301_v14  ;;  %359 = vpush %v281_v23  ;;  %vm308_vm14 = vweird.f32 %v380_v22 }
 0x17c   :  { %v382_v25 = vpop.eup %381  ;;  %vm309_vm1 = vmor %vm307_vm15, %vm308_vm14 }
 0x17d   :  { %v304_v26 = vsub.f32 1.0, %v303_v24  ;;  %v286_v27 = vmul.f32 %v382_v25, %v284_v16  ;;  %vm291_vm0 = vweird.f32 %v382_v25 }
 0x17e   :  { %vm292_vm3 = vmor %vm290_vm2, %vm291_vm0 }
 0x17f   :  { %v287_v28 = vsub.f32 1.0, %v286_v27  ;;  %v305_v29 = vmul.f32 %v380_v22, %v304_v26 }
 0x181   :  { %v288_v33 = vmul.f32 %v382_v25, %v287_v28  ;;  %v306_v35 = vadd.f32 %v380_v22, %v305_v29 }
 0x183   :  { %v289_v36 = vadd.f32 %v382_v25, %v288_v33  ;;  %v310_v37 = vsel %vm309_vm1, %v380_v22, %v306_v35 }
 0x184   :  { %v315_v41 = vsel %vm312_vm4, %v314_v38, %v310_v37 }
 0x185   :  { %v293_v40 = vsel %vm292_vm3, %v382_v25, %v289_v36 }
 0x186   :  { %v298_v42 = vsel %vm295_vm5, %v297_v39, %v293_v40 }
 0x187   :  { %361 = vpush %v298_v42 }
 0x188   :  { %363 = vpush %v315_v41 }
 0x1ac   :  { %s360_s5 = spop %359 }
 0x1ad   :  { %s283_s6 = smul.f32 %s360_s5, %s476_s3 }
 0x1af   :  { %s318_s7 = ssub.f32 0.2, %s283_s6 }
 0x1b8   :  { %s362_s8 = spop %361 }
 0x1b9   :  { %s300_s9 = smul.f32 %s362_s8, %s358_s30  ;;  %s364_s10 = spop %363 }
 0x1ba   :  { %s317_s11 = smul.f32 %s364_s10, %s478_s28 }
 0x1bb   :  { %s319_s12 = sadd.f32 %s318_s7, %s300_s9 }
 0x1bc   :  { %s321_s16 = sadd.f32 %s318_s7, %s317_s11 }
 0x1bd   :  { %s320_s18 = smax.f32 %s400_s17, %s319_s12 }
 0x1be   :  { %s322_s19 = smax.f32 %s400_s17, %s321_s16 }
 0x1bf   :  { %s323_s20 = sadd.f32 %s322_s19, %s320_s18 }
 0x1c1   :  { %325 = sst [smem:[#allocation7]] %s323_s20 }
 0x1c2   :  { %334 = dma.smem_to_hbm %s401_s21, 16, %s332_s15, [#allocation8]  }
 0x1c3   :  { %397 = dma.done.wait [#allocation8], 16  }
 0x1c4   :  { %398 = vsyncadd [#allocation8], 4294967280 }
 0x1c5   :  { %339 = sfence }
 0x1c6   :  { %340 = vsyncpa [#allocation8], 1 }

</bundles_post_ra>
